<compile_context>
chip_gen: v5e
topology: v5e:2x2
jax: 0.10.0
libtpu: 0.0.40
codegen_flags: <defaults>
</compile_context>

<pallas_src>
import jax
import jax.numpy as jnp
from jax.experimental import pallas as pl
from jax.experimental.pallas import tpu as pltpu


def _round_up(x: int, m: int) -> int:
    return ((x + m - 1) // m) * m


# ---------------------------------------------------------------------------
# Kernel 1a: single-pass linear  h = seq @ W  (reduction axis collapsed).
# ---------------------------------------------------------------------------
def _linear_kernel(x_ref, w_ref, o_ref):
    x = x_ref[...].astype(jnp.bfloat16)          # cast per tile (VPU, free)
    o_ref[...] = jnp.dot(x, w_ref[...],
                         preferred_element_type=jnp.float32).astype(o_ref.dtype)


def _linear_single_pass(x, w, *, tm):
    M, K = x.shape
    _, N = w.shape
    return pl.pallas_call(
        _linear_kernel,
        out_shape=jax.ShapeDtypeStruct((M, N), jnp.bfloat16),
        grid=(M // tm,),
        in_specs=[
            pl.BlockSpec((tm, K), lambda i: (i, 0)),
            pl.BlockSpec((K, N), lambda i: (0, 0)),
        ],
        out_specs=pl.BlockSpec((tm, N), lambda i: (i, 0)),
        compiler_params=pltpu.CompilerParams(
            dimension_semantics=("parallel",),
            vmem_limit_bytes=32 * 1024 * 1024),
    )(x, w)


# ---------------------------------------------------------------------------
# Kernel 1b: tiled-reduction fallback for large F_in / F_out.
# ---------------------------------------------------------------------------
def _matmul_kernel(a_ref, b_ref, o_ref, acc_ref):
    @pl.when(pl.program_id(2) == 0)
    def _():
        acc_ref[...] = jnp.zeros_like(acc_ref)

    acc_ref[...] += jnp.dot(a_ref[...].astype(jnp.bfloat16), b_ref[...],
                            preferred_element_type=jnp.float32)

    @pl.when(pl.program_id(2) == pl.num_programs(2) - 1)
    def _():
        o_ref[...] = acc_ref[...].astype(o_ref.dtype)


def _linear_tiled(a, b, *, tm, tn, tk):
    M, K = a.shape
    _, N = b.shape
    return pl.pallas_call(
        _matmul_kernel,
        out_shape=jax.ShapeDtypeStruct((M, N), jnp.bfloat16),
        grid=(M // tm, N // tn, K // tk),
        in_specs=[
            pl.BlockSpec((tm, tk), lambda i, j, k: (i, k)),
            pl.BlockSpec((tk, tn), lambda i, j, k: (k, j)),
        ],
        out_specs=pl.BlockSpec((tm, tn), lambda i, j, k: (i, j)),
        scratch_shapes=[pltpu.VMEM((tm, tn), jnp.float32)],
        compiler_params=pltpu.CompilerParams(
            dimension_semantics=("parallel", "parallel", "arbitrary"),
            vmem_limit_bytes=32 * 1024 * 1024),
    )(a, b)


# ---------------------------------------------------------------------------
# Kernel 2: out = PReLU(graph @ h + bias), fused epilogue on the f32 acc.
# Grid = (batch, rows, feature, k-reduction).
# ---------------------------------------------------------------------------
def _gcn_agg_kernel(alpha_ref, graph_ref, h_ref, bias_ref, o_ref, acc_ref):
    k = pl.program_id(3)

    @pl.when(k == 0)
    def _():
        acc_ref[...] = jnp.zeros_like(acc_ref)

    g = graph_ref[...].astype(jnp.bfloat16)      # in-kernel cast: no HBM pre-pass
    acc_ref[...] += jnp.dot(g, h_ref[...],
                            preferred_element_type=jnp.float32)

    @pl.when(k == pl.num_programs(3) - 1)
    def _():
        acc = acc_ref[...] + bias_ref[...].astype(jnp.float32)
        alpha = alpha_ref[0, 0]                       # shared PReLU slope (SMEM)
        o_ref[...] = jnp.where(acc > 0.0, acc, alpha * acc).astype(o_ref.dtype)


# ---------------------------------------------------------------------------
# Python wrapper: padding, dtype handling, chaining the two calls.
# ---------------------------------------------------------------------------
def gcn_forward(graph, seq, weight, bias, alpha):
    """Dense GCN forward: PReLU(graph @ (seq @ weight) + bias).

    graph : [N, N] or [B, N, N]       dense adjacency / propagation matrix
    seq   : [N, F_in] or [B, N, F_in] node features
    weight: [F_in, F_out]             transposed from torch Linear's [out_ft, in_ft]
    bias  : [F_out] or None
    alpha : scalar                    shared PReLU slope
    """
    squeeze = graph.ndim == 2
    if squeeze:
        graph, seq = graph[None], seq[None]
    B, N, F_in = seq.shape
    assert graph.shape == (B, N, N)
    F_out = weight.shape[1]
    if bias is None:
        bias = jnp.zeros((F_out,), jnp.float32)

    f32, bf16 = jnp.float32, jnp.bfloat16

    Np = _round_up(N, 256)
    Fip = _round_up(F_in, 256)
    Fop = _round_up(F_out, 128)
    Mp = B * Np

    # --- operand prep: avoid full-array pre-passes over the dominant arrays ---
    if N == Np and F_in == Fip:
        seq_flat = seq.reshape(Mp, Fip)              # kernel casts tiles to bf16
    else:
        seq_flat = (jnp.zeros((B, Np, Fip), bf16)
                    .at[:, :N, :F_in].set(seq.astype(bf16))
                    .reshape(Mp, Fip))
    w_p = jnp.zeros((Fip, Fop), bf16).at[:F_in, :F_out].set(weight.astype(bf16))
    bias_p = jnp.zeros((1, Fop), f32).at[0, :F_out].set(bias.astype(f32))
    alpha_arr = jnp.asarray(alpha, f32).reshape(1, 1)

    if N == Np:
        # Already tile-aligned: no padded copy, no bf16 pre-pass — graph stays
        # in HBM as-is and each tile is cast inside the kernel.
        graph_p = graph
    else:
        # Must copy for padding anyway; cast to bf16 while we're at it.
        graph_p = (jnp.zeros((B, Np, Np), bf16)
                   .at[:, :N, :N].set(graph.astype(bf16)))

    # 1) h = seq @ weight   (computed exactly once over the flattened batch)
    if Fip <= 1024 and Fop <= 1024:
        tm_lin = 512 if Mp % 512 == 0 else 256
        h = _linear_single_pass(seq_flat, w_p, tm=tm_lin)
    else:
        tn_lin = 256 if Fop % 256 == 0 else 128
        h = _linear_tiled(seq_flat, w_p, tm=256, tn=tn_lin, tk=256)
    h = h.reshape(B, Np, Fop)

    # 2) out = PReLU(graph @ h + bias)
    # TN = full padded feature width when it fits -> graph is read exactly once.
    if Fop <= 1024:
        TN = Fop
    elif Fop % 512 == 0:
        TN = 512
    elif Fop % 256 == 0:
        TN = 256
    else:
        TN = 128
    TM = 512 if Np % 512 == 0 else 256
    TK = 512 if Np % 512 == 0 else 256
    # Keep >= 2 "parallel" grid iterations so both v7x TensorCores get work.
    while B * (Np // TM) * (Fop // TN) < 2 and TM > 128:
        TM //= 2

    grid = (B, Np // TM, Fop // TN, Np // TK)
    out_p = pl.pallas_call(
        _gcn_agg_kernel,
        out_shape=jax.ShapeDtypeStruct((B, Np, Fop), f32),
        grid=grid,
        in_specs=[
            pl.BlockSpec(memory_space=pltpu.MemorySpace.SMEM),            # alpha
            pl.BlockSpec((None, TM, TK), lambda b, i, j, k: (b, i, k)),   # graph
            pl.BlockSpec((None, TK, TN), lambda b, i, j, k: (b, k, j)),   # h
            pl.BlockSpec((1, TN), lambda b, i, j, k: (0, j)),             # bias
        ],
        out_specs=pl.BlockSpec((None, TM, TN), lambda b, i, j, k: (b, i, j)),
        scratch_shapes=[pltpu.VMEM((TM, TN), jnp.float32)],
        compiler_params=pltpu.CompilerParams(
            dimension_semantics=("parallel", "parallel", "parallel",
                                 "arbitrary"),
            vmem_limit_bytes=32 * 1024 * 1024),
    )(alpha_arr, graph_p, h, bias_p)

    out = out_p[:, :N, :F_out]
    return out[0] if squeeze else out


# Pure-JAX reference with the same bf16-input / f32-accumulate numerics.
def gcn_reference(graph, seq, weight, bias, alpha):
    bf16, f32 = jnp.bfloat16, jnp.float32
    h = jnp.dot(seq.astype(bf16), weight.astype(bf16),
                preferred_element_type=f32).astype(bf16)
    out = jnp.matmul(graph.astype(bf16), h, preferred_element_type=f32)
    out = out + bias.astype(f32)
    return jnp.where(out > 0.0, out, jnp.asarray(alpha, f32) * out)


if __name__ == "__main__":
    key = jax.random.PRNGKey(0)
    k1, k2, k3, k4, k5, k6 = jax.random.split(key, 6)

    alpha = jnp.float32(0.25)  # PReLU default: single shared parameter

    # --- single-graph (torch.mm) path: N aligned -> no graph pre-pass copy ---
    N, F_in, F_out = 256, 192, 96
    graph = jax.random.normal(k1, (N, N), jnp.float32) / jnp.sqrt(float(N))
    seq = jax.random.normal(k2, (N, F_in), jnp.float32)
    # torch Linear weight is [out_ft, in_ft]; the kernel takes its transpose.
    w_torch = jax.random.normal(k3, (F_out, F_in), jnp.float32) / jnp.sqrt(float(F_in))
    weight = w_torch.T
    bias = jax.random.normal(k4, (F_out,), jnp.float32) * 0.1

    out = jax.block_until_ready(gcn_forward(graph, seq, weight, bias, alpha))
    ref = jax.block_until_ready(gcn_reference(graph, seq, weight, bias, alpha))
    assert out.shape == (N, F_out), out.shape
    err = float(jnp.max(jnp.abs(out - ref)))
    assert jnp.allclose(out, ref, rtol=1e-2, atol=1e-2), f"2D max_err={err}"

    # --- batched (torch.bmm) path: non-aligned N exercises the padding branch ---
    B, Nb, F_in_b, F_out_b = 2, 200, 64, 48
    graph_b = jax.random.normal(k5, (B, Nb, Nb), jnp.float32) / jnp.sqrt(float(Nb))
    seq_b = jax.random.normal(k6, (B, Nb, F_in_b), jnp.float32)
    w_b = (jax.random.normal(k3, (F_out_b, F_in_b), jnp.float32)
           / jnp.sqrt(float(F_in_b))).T
    bias_b = jnp.zeros((F_out_b,), jnp.float32)

    out_b = jax.block_until_ready(gcn_forward(graph_b, seq_b, w_b, bias_b, alpha))
    ref_b = jax.block_until_ready(gcn_reference(graph_b, seq_b, w_b, bias_b, alpha))
    assert out_b.shape == (B, Nb, F_out_b), out_b.shape
    err_b = float(jnp.max(jnp.abs(out_b - ref_b)))
    assert jnp.allclose(out_b, ref_b, rtol=1e-2, atol=1e-2), f"3D max_err={err_b}"

    print("KERNEL_OK")
</pallas_src>

<mosaic_0001>
module attributes {stable_mosaic.version = 11 : i64} {
  func.func @_linear_kernel(%arg0: i32, %arg1: memref<256x256xbf16, #tpu.memory_space<vmem>>, %arg2: memref<256x128xbf16, #tpu.memory_space<vmem>>, %arg3: memref<256x128xbf16, #tpu.memory_space<vmem>>) attributes {dimension_semantics = [#tpu.dimension_semantics<parallel>], iteration_bounds = array<i64: 1>, scalar_prefetch = 0 : i64, scratch_operands = 0 : i64, tpu.core_type = #tpu.core_type<tc>, window_params = [{transform_indices = @transform_0, window_bounds = array<i64: 256, 256>}, {pipeline_mode = #tpu.pipeline_mode<synchronous>, transform_indices = @transform_1, window_bounds = array<i64: 256, 128>}, {transform_indices = @transform_2, window_bounds = array<i64: 256, 128>}]} {
    %c0 = arith.constant 0 : index
    %c0_0 = arith.constant 0 : index
    %0 = vector.load %arg1[%c0, %c0_0] : memref<256x256xbf16, #tpu.memory_space<vmem>>, vector<256x256xbf16>
    %c0_1 = arith.constant 0 : index
    %c0_2 = arith.constant 0 : index
    %1 = vector.load %arg2[%c0_1, %c0_2] : memref<256x128xbf16, #tpu.memory_space<vmem>>, vector<256x128xbf16>
    %cst = arith.constant dense<0.000000e+00> : vector<256x128xf32>
    %2 = tpu.matmul %0, %1, %cst {dimension_numbers = #tpu.dot_dimension_numbers<[1], [0], [0], [1], [0, 0, 1, 1], [], []>} : vector<256x256xbf16>, vector<256x128xbf16>, vector<256x128xf32> -> vector<256x128xf32>
    %3 = arith.truncf %2 : vector<256x128xf32> to vector<256x128xbf16>
    %c0_3 = arith.constant 0 : index
    %c0_4 = arith.constant 0 : index
    %4 = vector.load %arg3[%c0_3, %c0_4] : memref<256x128xbf16, #tpu.memory_space<vmem>>, vector<256x128xbf16>
    tpu.vector_store %arg3[%c0_3, %c0_4], %3 {strides = array<i32>} : memref<256x128xbf16, #tpu.memory_space<vmem>>, vector<256x128xbf16>,
    return
  }
  func.func @transform_0(%arg0: i32) -> (i32, i32) {
    %c0_i32 = arith.constant 0 : i32
    %c0_i32_0 = arith.constant 0 : i32
    return %arg0, %c0_i32 : i32, i32
  }
  func.func @transform_1(%arg0: i32) -> (i32, i32) {
    %c0_i32 = arith.constant 0 : i32
    %c0_i32_0 = arith.constant 0 : i32
    %c0_i32_1 = arith.constant 0 : i32
    return %c0_i32, %c0_i32_0 : i32, i32
  }
  func.func @transform_2(%arg0: i32) -> (i32, i32) {
    %c0_i32 = arith.constant 0 : i32
    %c0_i32_0 = arith.constant 0 : i32
    return %arg0, %c0_i32 : i32, i32
  }
}

</mosaic_0001>

<bundles_post_ra>
// kernel: tpu_custom_call.1
= control target key start
LH: loop header
LB: loop body
LE: loop exit
PB: predicated region body
PF: predicated region fallthrough
CT: control target
= control target key end

     0   :  { %7 = vsyncpa [#allocation3], 0  ;;  %s1099_s0 = inlined_call_operand.hbm [shape: bf16[256,256], index: 0, kind: input, shape index: {}]   ;;  %s1100_s1 = inlined_call_operand.hbm [shape: bf16[256,128], index: 1, kind: input, shape index: {}]   ;;  %s1101_s2 = inlined_call_operand.hbm [shape: bf16[256,128], index: 2, kind: output, shape index: {}]  }
   0x1   :  { %8 = vsyncpa [#allocation6], 0 }
   0x2   :  { %9 = vsyncpa [#allocation4], 0  ;;  %s14_s11 = sshll.u32 %s1099_s0, 4  ;;  %s1062_s12 = smov [#allocation2]   ;;  %s15_s11 = int_to_ptr.hbm [resolvable:$true] %s14_s11 }
   0x3   :  { %s16_s13 = sshll.u32 %s1062_s12, 4  ;;  %s27_s16 = sshll.u32 %s1100_s1, 4  ;;  %s17_s13 = int_to_ptr.vmem [resolvable:$true] %s16_s13  ;;  %s28_s16 = int_to_ptr.hbm [resolvable:$true] %s27_s16 }
   0x4   :  { %s1063_s17 = smov 128   ;;  %s1064_s18 = smov 8  }
   0x5   :  { %22 = dma.hbm_to_vmem [thread:$0]  %s15_s11, 4096, %s17_s13, [#allocation3], %s1063_s17, %s1063_s17, %s1064_s18  }
   0x6   :  { %s1065_s19 = smov [#allocation5]   ;;  %s1066_s21 = smov 64  }
   0x7   :  { %s29_s20 = sshll.u32 %s1065_s19, 4  ;;  %s1067_s22 = smov 4   ;;  %s30_s20 = int_to_ptr.vmem [resolvable:$true] %s29_s20 }
   0x8   :  { %35 = dma.hbm_to_vmem [thread:$0]  %s28_s16, 2048, %s30_s20, [#allocation6], %s1066_s21, %s1066_s21, %s1067_s22  }
   0x9   :  { %1056 = dma.done.wait [#allocation3], 4096  }
   0xa   :  { %1057 = vsyncadd [#allocation3], 4294963200 }
   0xb   :  { %1058 = dma.done.wait [#allocation6], 2048  }
   0xc   :  { %1059 = vsyncadd [#allocation6], 4294965248  ;;  %v857_v0 = vld [vmem:[#allocation5 + $0x38] sm:$0xff]  ;;  %v856_v2 = vld [vmem:[#allocation5 + $0x30] sm:$0xff]  ;;  %s1068_s0 = smov [#allocation7]   ;;  %s612_s25 = sshll.u32 %s1101_s2, 4  ;;  %s613_s25 = int_to_ptr.hbm [resolvable:$true] %s612_s25 }
   0xd   :  { %v865_v1 = vld [vmem:[#allocation5 + $0x78] sm:$0xff]  ;;  %364 = vmatpush.bf16.msra.mxu0 %v857_v0  ;;  %961 = vmatpush.bf16.msra.mxu2 %v857_v0  ;;  %v864_v3 = vld [vmem:[#allocation5 + $0x70] sm:$0xff]  ;;  %v855_v4 = vld [vmem:[#allocation5 + $0x28] sm:$0xff]  ;;  %s610_s1 = sshll.u32 %s1068_s0, 4  ;;  %s611_s1 = int_to_ptr.vmem [resolvable:$true] %s610_s1 }
   0xe   :  { %453 = vmatpush.bf16.msra.mxu1 %v865_v1  ;;  %969 = vmatpush.bf16.msra.mxu3 %v865_v1  ;;  %v863_v5 = vld [vmem:[#allocation5 + $0x68] sm:$0xff]  ;;  %v854_v6 = vld [vmem:[#allocation5 + $0x20] sm:$0xff]  ;;  %v853_v8 = vld [vmem:[#allocation5 + $0x18] sm:$0xff] }
   0xf   :  { %v862_v7 = vld [vmem:[#allocation5 + $0x60] sm:$0xff]  ;;  %v861_v9 = vld [vmem:[#allocation5 + $0x58] sm:$0xff]  ;;  %v852_v10 = vld [vmem:[#allocation5 + $0x10] sm:$0xff] }
  0x10   :  { %v860_v11 = vld [vmem:[#allocation5 + $0x50] sm:$0xff]  ;;  %v851_v12 = vld [vmem:[#allocation5 + $0x8] sm:$0xff]  ;;  %v850_v14 = vld [vmem:[#allocation5] sm:$0xff] }
  0x11   :  { %365 = vmatpush.bf16.msra.mxu0 %v856_v2  ;;  %962 = vmatpush.bf16.msra.mxu2 %v856_v2  ;;  %v859_v13 = vld [vmem:[#allocation5 + $0x48] sm:$0xff]  ;;  %v858_v15 = vld [vmem:[#allocation5 + $0x40] sm:$0xff]  ;;  %v636_v28 = vld [vmem:[#allocation2 + $0x10] sm:$0xf] }
  0x12   :  { %454 = vmatpush.bf16.msra.mxu1 %v864_v3  ;;  %970 = vmatpush.bf16.msra.mxu3 %v864_v3  ;;  %v628_v16 = vld [vmem:[#allocation2] sm:$0xf]  ;;  %v819_v17 = vld [vmem:[#allocation2 + $0x4] sm:$0xf0]  ;;  %v818_v20 = vld [vmem:[#allocation2 + $0x4] sm:$0xf] }
  0x13   :  { %v692_v18 = vld [vmem:[#allocation2 + $0x80] sm:$0xf]  ;;  %v835_v19 = vld [vmem:[#allocation2 + $0x84] sm:$0xf0]  ;;  %v630_v21 = vld [vmem:[#allocation2 + $0x8] sm:$0xf0]  ;;  %v629_v24 = vor.u32 %v819_v17, %v628_v16 }
  0x14   :  { %v834_v22 = vld [vmem:[#allocation2 + $0x84] sm:$0xf]  ;;  %v694_v23 = vld [vmem:[#allocation2 + $0x88] sm:$0xf0]  ;;  %v693_v25 = vor.u32 %v835_v19, %v692_v18  ;;  %v633_v26 = vor.u32 %v818_v20, %v630_v21  ;;  %v821_v29 = vld [vmem:[#allocation2 + $0x14] sm:$0xf0] }
  0x15   :  { %366 = vmatpush.bf16.msra.mxu0 %v855_v4  ;;  %963 = vmatpush.bf16.msra.mxu2 %v855_v4  ;;  %v697_v27 = vor.u32 %v834_v22, %v694_v23  ;;  %v700_v30 = vld [vmem:[#allocation2 + $0x90] sm:$0xf]  ;;  %v837_v31 = vld [vmem:[#allocation2 + $0x94] sm:$0xf0]  ;;  %v820_v32 = vld [vmem:[#allocation2 + $0x14] sm:$0xf]  ;;  %v637_v36 = vor.u32 %v821_v29, %v636_v28 }
  0x16   :  { %455 = vmatpush.bf16.msra.mxu1 %v863_v5  ;;  %971 = vmatpush.bf16.msra.mxu3 %v863_v5  ;;  %v638_v33 = vld [vmem:[#allocation2 + $0x18] sm:$0xf0]  ;;  %v836_v34 = vld [vmem:[#allocation2 + $0x94] sm:$0xf]  ;;  %v701_v37 = vor.u32 %v837_v31, %v700_v30  ;;  %v644_v40 = vld [vmem:[#allocation2 + $0x20] sm:$0xf] }
  0x17   :  { %v702_v35 = vld [vmem:[#allocation2 + $0x98] sm:$0xf0]  ;;  %v641_v38 = vor.u32 %v820_v32, %v638_v33  ;;  %v823_v41 = vld [vmem:[#allocation2 + $0x24] sm:$0xf0]  ;;  %v708_v42 = vld [vmem:[#allocation2 + $0xa0] sm:$0xf] }
  0x18   :  { %v705_v39 = vor.u32 %v836_v34, %v702_v35  ;;  %v839_v43 = vld [vmem:[#allocation2 + $0xa4] sm:$0xf0]  ;;  %v822_v44 = vld [vmem:[#allocation2 + $0x24] sm:$0xf]  ;;  %v646_v45 = vld [vmem:[#allocation2 + $0x28] sm:$0xf0]  ;;  %v645_v48 = vor.u32 %v823_v41, %v644_v40 }
  0x19   :  { %367 = vmatpush.bf16.msra.mxu0 %v854_v6  ;;  %964 = vmatpush.bf16.msra.mxu2 %v854_v6  ;;  %v838_v46 = vld [vmem:[#allocation2 + $0xa4] sm:$0xf]  ;;  %v710_v47 = vld [vmem:[#allocation2 + $0xa8] sm:$0xf0]  ;;  %v709_v49 = vor.u32 %v839_v43, %v708_v42  ;;  %v649_v50 = vor.u32 %v822_v44, %v646_v45  ;;  %v652_v52 = vld [vmem:[#allocation2 + $0x30] sm:$0xf] }
  0x1a   :  { %456 = vmatpush.bf16.msra.mxu1 %v862_v7  ;;  %972 = vmatpush.bf16.msra.mxu3 %v862_v7  ;;  %v713_v51 = vor.u32 %v838_v46, %v710_v47  ;;  %v825_v53 = vld [vmem:[#allocation2 + $0x34] sm:$0xf0]  ;;  %v716_v54 = vld [vmem:[#allocation2 + $0xb0] sm:$0xf]  ;;  %v824_v56 = vld [vmem:[#allocation2 + $0x34] sm:$0xf] }
  0x1b   :  { %v841_v55 = vld [vmem:[#allocation2 + $0xb4] sm:$0xf0]  ;;  %v654_v57 = vld [vmem:[#allocation2 + $0x38] sm:$0xf0]  ;;  %v840_v58 = vld [vmem:[#allocation2 + $0xb4] sm:$0xf]  ;;  %v653_v60 = vor.u32 %v825_v53, %v652_v52 }
  0x1c   :  { %v718_v59 = vld [vmem:[#allocation2 + $0xb8] sm:$0xf0]  ;;  %v717_v61 = vor.u32 %v841_v55, %v716_v54  ;;  %v657_v62 = vor.u32 %v824_v56, %v654_v57  ;;  %v660_v0 = vld [vmem:[#allocation2 + $0x40] sm:$0xf]  ;;  %v827_v1 = vld [vmem:[#allocation2 + $0x44] sm:$0xf0] }
  0x1d   :  { %368 = vmatpush.bf16.msra.mxu0 %v853_v8  ;;  %965 = vmatpush.bf16.msra.mxu2 %v853_v8  ;;  %v721_v63 = vor.u32 %v840_v58, %v718_v59  ;;  %v724_v2 = vld [vmem:[#allocation2 + $0xc0] sm:$0xf]  ;;  %v843_v3 = vld [vmem:[#allocation2 + $0xc4] sm:$0xf0]  ;;  %v826_v4 = vld [vmem:[#allocation2 + $0x44] sm:$0xf]  ;;  %v661_v8 = vor.u32 %v827_v1, %v660_v0 }
  0x1e   :  { %457 = vmatpush.bf16.msra.mxu1 %v861_v9  ;;  %973 = vmatpush.bf16.msra.mxu3 %v861_v9  ;;  %v662_v5 = vld [vmem:[#allocation2 + $0x48] sm:$0xf0]  ;;  %v842_v6 = vld [vmem:[#allocation2 + $0xc4] sm:$0xf]  ;;  %v725_v9 = vor.u32 %v843_v3, %v724_v2  ;;  %v828_v16 = vld [vmem:[#allocation2 + $0x54] sm:$0xf] }
  0x1f   :  { %v726_v7 = vld [vmem:[#allocation2 + $0xc8] sm:$0xf0]  ;;  %v670_v17 = vld [vmem:[#allocation2 + $0x58] sm:$0xf0]  ;;  %v844_v18 = vld [vmem:[#allocation2 + $0xd4] sm:$0xf] }
  0x20   :  { %v734_v19 = vld [vmem:[#allocation2 + $0xd8] sm:$0xf0]  ;;  %v673_v22 = vor.u32 %v828_v16, %v670_v17  ;;  %v830_v28 = vld [vmem:[#allocation2 + $0x64] sm:$0xf]  ;;  %v678_v29 = vld [vmem:[#allocation2 + $0x68] sm:$0xf0] }
  0x21   :  { %369 = vmatpush.bf16.msra.mxu0 %v852_v10  ;;  %966 = vmatpush.bf16.msra.mxu2 %v852_v10  ;;  %v665_v10 = vor.u32 %v826_v4, %v662_v5  ;;  %v737_v23 = vor.u32 %v844_v18, %v734_v19  ;;  %v846_v30 = vld [vmem:[#allocation2 + $0xe4] sm:$0xf]  ;;  %v742_v31 = vld [vmem:[#allocation2 + $0xe8] sm:$0xf0]  ;;  %v681_v34 = vor.u32 %v830_v28, %v678_v29  ;;  %v832_v40 = vld [vmem:[#allocation2 + $0x74] sm:$0xf] }
  0x22   :  { %458 = vmatpush.bf16.msra.mxu1 %v860_v11  ;;  %974 = vmatpush.bf16.msra.mxu3 %v860_v11  ;;  %v729_v11 = vor.u32 %v842_v6, %v726_v7  ;;  %v745_v35 = vor.u32 %v846_v30, %v742_v31  ;;  %v686_v41 = vld [vmem:[#allocation2 + $0x78] sm:$0xf0]  ;;  %v848_v42 = vld [vmem:[#allocation2 + $0xf4] sm:$0xf] }
  0x23   :  { %v750_v43 = vld [vmem:[#allocation2 + $0xf8] sm:$0xf0]  ;;  %v689_v46 = vor.u32 %v832_v40, %v686_v41 }
  0x24   :  { %v753_v47 = vor.u32 %v848_v42, %v750_v43 }
  0x25   :  { %370 = vmatpush.bf16.msra.mxu0 %v851_v12  ;;  %967 = vmatpush.bf16.msra.mxu2 %v851_v12  ;;  %v668_v12 = vld [vmem:[#allocation2 + $0x50] sm:$0xf] }
  0x26   :  { %459 = vmatpush.bf16.msra.mxu1 %v859_v13  ;;  %975 = vmatpush.bf16.msra.mxu3 %v859_v13  ;;  %v829_v13 = vld [vmem:[#allocation2 + $0x54] sm:$0xf0] }
  0x27   :  { %v669_v20 = vor.u32 %v829_v13, %v668_v12 }
  0x29   :  { %371 = vmatpush.bf16.msra.mxu0 %v850_v14  ;;  %968 = vmatpush.bf16.msra.mxu2 %v850_v14  ;;  %v732_v14 = vld [vmem:[#allocation2 + $0xd0] sm:$0xf] }
  0x2a   :  { %460 = vmatpush.bf16.msra.mxu1 %v858_v15  ;;  %976 = vmatpush.bf16.msra.mxu3 %v858_v15  ;;  %v845_v15 = vld [vmem:[#allocation2 + $0xd4] sm:$0xf0] }
  0x2b   :  { %v733_v21 = vor.u32 %v845_v15, %v732_v14 }
  0x2c   :  { %372 = vmatmul.bf16.vlgmr.msra.gmra.mxu0 %v629_v24  ;;  %412 = vmatmul.bf16.vlgmr.msra.gmra.mxu2 %v693_v25  ;;  %v676_v24 = vld [vmem:[#allocation2 + $0x60] sm:$0xf]  ;;  %v831_v25 = vld [vmem:[#allocation2 + $0x64] sm:$0xf0] }
  0x2d   :  { %461 = vmatmul.bf16.vlgmr.msra.gmra.mxu1 %v633_v26  ;;  %501 = vmatmul.bf16.vlgmr.msra.gmra.mxu3 %v697_v27  ;;  %v740_v26 = vld [vmem:[#allocation2 + $0xe0] sm:$0xf]  ;;  %v847_v27 = vld [vmem:[#allocation2 + $0xe4] sm:$0xf0]  ;;  %v677_v32 = vor.u32 %v831_v25, %v676_v24 }
  0x2e   :  { %v741_v33 = vor.u32 %v847_v27, %v740_v26 }
  0x3c   :  { %377 = vmatmul.bf16.gmra.mxu0 %v637_v36  ;;  %417 = vmatmul.bf16.gmra.mxu2 %v701_v37  ;;  %v684_v36 = vld [vmem:[#allocation2 + $0x70] sm:$0xf]  ;;  %v833_v37 = vld [vmem:[#allocation2 + $0x74] sm:$0xf0] }
  0x3d   :  { %466 = vmatmul.bf16.gmra.mxu1 %v641_v38  ;;  %506 = vmatmul.bf16.gmra.mxu3 %v705_v39  ;;  %v748_v38 = vld [vmem:[#allocation2 + $0xf0] sm:$0xf]  ;;  %v849_v39 = vld [vmem:[#allocation2 + $0xf4] sm:$0xf0]  ;;  %v685_v44 = vor.u32 %v833_v37, %v684_v36 }
  0x3e   :  { %v749_v45 = vor.u32 %v849_v39, %v748_v38 }
  0x4c   :  { %382 = vmatmul.bf16.gmra.mxu0 %v645_v48  ;;  %422 = vmatmul.bf16.gmra.mxu2 %v709_v49 }
  0x4d   :  { %471 = vmatmul.bf16.gmra.mxu1 %v649_v50  ;;  %511 = vmatmul.bf16.gmra.mxu3 %v713_v51 }
  0x5c   :  { %387 = vmatmul.bf16.gmra.mxu0 %v653_v60  ;;  %427 = vmatmul.bf16.gmra.mxu2 %v717_v61 }
  0x5d   :  { %476 = vmatmul.bf16.gmra.mxu1 %v657_v62  ;;  %516 = vmatmul.bf16.gmra.mxu3 %v721_v63 }
  0x6c   :  { %392 = vmatmul.bf16.gmra.mxu0 %v661_v8  ;;  %432 = vmatmul.bf16.gmra.mxu2 %v725_v9 }
  0x6d   :  { %481 = vmatmul.bf16.gmra.mxu1 %v665_v10  ;;  %521 = vmatmul.bf16.gmra.mxu3 %v729_v11 }
  0x7c   :  { %397 = vmatmul.bf16.gmra.mxu0 %v669_v20  ;;  %437 = vmatmul.bf16.gmra.mxu2 %v733_v21 }
  0x7d   :  { %486 = vmatmul.bf16.gmra.mxu1 %v673_v22  ;;  %526 = vmatmul.bf16.gmra.mxu3 %v737_v23 }
  0x8c   :  { %402 = vmatmul.bf16.gmra.mxu0 %v677_v32  ;;  %442 = vmatmul.bf16.gmra.mxu2 %v741_v33 }
  0x8d   :  { %491 = vmatmul.bf16.gmra.mxu1 %v681_v34  ;;  %531 = vmatmul.bf16.gmra.mxu3 %v745_v35 }
  0x9c   :  { %407 = vmatmul.bf16.gmra.mxu0 %v685_v44  ;;  %447 = vmatmul.bf16.gmra.mxu2 %v749_v45 }
  0x9d   :  { %496 = vmatmul.bf16.gmra.mxu1 %v689_v46  ;;  %536 = vmatmul.bf16.gmra.mxu3 %v753_v47 }
  0xa9   :  { %v373_v48 = vpop.f32.mrf.mxu0 }
  0xaa   :  { %v462_v49 = vpop.f32.mrf.mxu1 }
  0xab   :  { %v463_v54 = vadd.f32 %v462_v49, %v373_v48 }
  0xaf   :  { %v413_v50 = vpop.f32.mrf.mxu2 }
  0xb0   :  { %v502_v51 = vpop.f32.mrf.mxu3 }
  0xb1   :  { %v375_v52 = vpop.f32.mrf.mxu0  ;;  %v503_v59 = vadd.f32 %v502_v51, %v413_v50 }
  0xb2   :  { %v464_v53 = vpop.f32.mrf.mxu1 }
  0xb3   :  { %v465_v55 = vadd.f32 %v464_v53, %v375_v52 }
  0xb5   :  { %v869_v56 = vpack.c.bf16 %v465_v55, %v463_v54 }
  0xb7   :  { %870 = vst [vmem:[#allocation7] sm:$0xff] %v869_v56   ;;  %v415_v57 = vpop.f32.mrf.mxu2 }
  0xb8   :  { %v504_v58 = vpop.f32.mrf.mxu3 }
  0xb9   :  { %v505_v60 = vadd.f32 %v504_v58, %v415_v57  ;;  %v378_v61 = vpop.f32.mrf.mxu0 }
  0xba   :  { %v467_v62 = vpop.f32.mrf.mxu1 }
  0xbb   :  { %v909_v63 = vpack.c.bf16 %v505_v60, %v503_v59  ;;  %v468_v4 = vadd.f32 %v467_v62, %v378_v61 }
  0xbd   :  { %953 = vst [vmem:[#allocation7 + $0x40] sm:$0xff] %v909_v63  }
  0xbf   :  { %v418_v0 = vpop.f32.mrf.mxu2 }
  0xc0   :  { %v507_v1 = vpop.f32.mrf.mxu3 }
  0xc1   :  { %v380_v2 = vpop.f32.mrf.mxu0  ;;  %v508_v9 = vadd.f32 %v507_v1, %v418_v0 }
  0xc2   :  { %v469_v3 = vpop.f32.mrf.mxu1 }
  0xc3   :  { %v470_v5 = vadd.f32 %v469_v3, %v380_v2 }
  0xc5   :  { %v874_v6 = vpack.c.bf16 %v470_v5, %v468_v4 }
  0xc7   :  { %946 = vst [vmem:[#allocation7 + $0x8] sm:$0xff] %v874_v6   ;;  %v420_v7 = vpop.f32.mrf.mxu2 }
  0xc8   :  { %v509_v8 = vpop.f32.mrf.mxu3 }
  0xc9   :  { %v510_v10 = vadd.f32 %v509_v8, %v420_v7  ;;  %v383_v11 = vpop.f32.mrf.mxu0 }
  0xca   :  { %v472_v12 = vpop.f32.mrf.mxu1 }
  0xcb   :  { %v914_v13 = vpack.c.bf16 %v510_v10, %v508_v9  ;;  %v473_v18 = vadd.f32 %v472_v12, %v383_v11 }
  0xcd   :  { %954 = vst [vmem:[#allocation7 + $0x48] sm:$0xff] %v914_v13  }
  0xcf   :  { %v423_v14 = vpop.f32.mrf.mxu2 }
  0xd0   :  { %v512_v15 = vpop.f32.mrf.mxu3 }
  0xd1   :  { %v385_v16 = vpop.f32.mrf.mxu0  ;;  %v513_v23 = vadd.f32 %v512_v15, %v423_v14 }
  0xd2   :  { %v474_v17 = vpop.f32.mrf.mxu1 }
  0xd3   :  { %v475_v19 = vadd.f32 %v474_v17, %v385_v16 }
  0xd5   :  { %v879_v20 = vpack.c.bf16 %v475_v19, %v473_v18 }
  0xd7   :  { %947 = vst [vmem:[#allocation7 + $0x10] sm:$0xff] %v879_v20   ;;  %v425_v21 = vpop.f32.mrf.mxu2 }
  0xd8   :  { %v514_v22 = vpop.f32.mrf.mxu3 }
  0xd9   :  { %v515_v24 = vadd.f32 %v514_v22, %v425_v21  ;;  %v388_v25 = vpop.f32.mrf.mxu0 }
  0xda   :  { %v477_v26 = vpop.f32.mrf.mxu1 }
  0xdb   :  { %v919_v27 = vpack.c.bf16 %v515_v24, %v513_v23  ;;  %v478_v32 = vadd.f32 %v477_v26, %v388_v25 }
  0xdd   :  { %955 = vst [vmem:[#allocation7 + $0x50] sm:$0xff] %v919_v27  }
  0xdf   :  { %v428_v28 = vpop.f32.mrf.mxu2 }
  0xe0   :  { %v517_v29 = vpop.f32.mrf.mxu3 }
  0xe1   :  { %v390_v30 = vpop.f32.mrf.mxu0  ;;  %v518_v37 = vadd.f32 %v517_v29, %v428_v28 }
  0xe2   :  { %v479_v31 = vpop.f32.mrf.mxu1 }
  0xe3   :  { %v480_v33 = vadd.f32 %v479_v31, %v390_v30 }
  0xe5   :  { %v884_v34 = vpack.c.bf16 %v480_v33, %v478_v32 }
  0xe7   :  { %948 = vst [vmem:[#allocation7 + $0x18] sm:$0xff] %v884_v34   ;;  %v430_v35 = vpop.f32.mrf.mxu2 }
  0xe8   :  { %v519_v36 = vpop.f32.mrf.mxu3 }
  0xe9   :  { %v520_v38 = vadd.f32 %v519_v36, %v430_v35  ;;  %v393_v39 = vpop.f32.mrf.mxu0 }
  0xea   :  { %v482_v40 = vpop.f32.mrf.mxu1 }
  0xeb   :  { %v924_v41 = vpack.c.bf16 %v520_v38, %v518_v37  ;;  %v483_v46 = vadd.f32 %v482_v40, %v393_v39 }
  0xed   :  { %956 = vst [vmem:[#allocation7 + $0x58] sm:$0xff] %v924_v41  }
  0xef   :  { %v433_v42 = vpop.f32.mrf.mxu2 }
  0xf0   :  { %v522_v43 = vpop.f32.mrf.mxu3 }
  0xf1   :  { %v395_v44 = vpop.f32.mrf.mxu0  ;;  %v523_v51 = vadd.f32 %v522_v43, %v433_v42 }
  0xf2   :  { %v484_v45 = vpop.f32.mrf.mxu1 }
  0xf3   :  { %v485_v47 = vadd.f32 %v484_v45, %v395_v44 }
  0xf5   :  { %v889_v48 = vpack.c.bf16 %v485_v47, %v483_v46 }
  0xf7   :  { %949 = vst [vmem:[#allocation7 + $0x20] sm:$0xff] %v889_v48   ;;  %v435_v49 = vpop.f32.mrf.mxu2 }
  0xf8   :  { %v524_v50 = vpop.f32.mrf.mxu3 }
  0xf9   :  { %v525_v52 = vadd.f32 %v524_v50, %v435_v49  ;;  %v398_v53 = vpop.f32.mrf.mxu0 }
  0xfa   :  { %v487_v54 = vpop.f32.mrf.mxu1 }
  0xfb   :  { %v929_v55 = vpack.c.bf16 %v525_v52, %v523_v51  ;;  %v488_v60 = vadd.f32 %v487_v54, %v398_v53 }
  0xfd   :  { %957 = vst [vmem:[#allocation7 + $0x60] sm:$0xff] %v929_v55  }
  0xff   :  { %v438_v56 = vpop.f32.mrf.mxu2 }
 0x100   :  { %v527_v57 = vpop.f32.mrf.mxu3 }
 0x101   :  { %v400_v58 = vpop.f32.mrf.mxu0  ;;  %v528_v1 = vadd.f32 %v527_v57, %v438_v56 }
 0x102   :  { %v489_v59 = vpop.f32.mrf.mxu1 }
 0x103   :  { %v490_v61 = vadd.f32 %v489_v59, %v400_v58 }
 0x105   :  { %v894_v62 = vpack.c.bf16 %v490_v61, %v488_v60 }
 0x107   :  { %950 = vst [vmem:[#allocation7 + $0x28] sm:$0xff] %v894_v62   ;;  %v440_v63 = vpop.f32.mrf.mxu2 }
 0x108   :  { %v529_v0 = vpop.f32.mrf.mxu3 }
 0x109   :  { %v530_v2 = vadd.f32 %v529_v0, %v440_v63  ;;  %v403_v3 = vpop.f32.mrf.mxu0 }
 0x10a   :  { %v492_v4 = vpop.f32.mrf.mxu1 }
 0x10b   :  { %v934_v5 = vpack.c.bf16 %v530_v2, %v528_v1  ;;  %v493_v10 = vadd.f32 %v492_v4, %v403_v3 }
 0x10d   :  { %958 = vst [vmem:[#allocation7 + $0x68] sm:$0xff] %v934_v5  }
 0x10f   :  { %v443_v6 = vpop.f32.mrf.mxu2 }
 0x110   :  { %v532_v7 = vpop.f32.mrf.mxu3 }
 0x111   :  { %v405_v8 = vpop.f32.mrf.mxu0  ;;  %v533_v15 = vadd.f32 %v532_v7, %v443_v6 }
 0x112   :  { %v494_v9 = vpop.f32.mrf.mxu1 }
 0x113   :  { %v495_v11 = vadd.f32 %v494_v9, %v405_v8 }
 0x115   :  { %v899_v12 = vpack.c.bf16 %v495_v11, %v493_v10 }
 0x117   :  { %951 = vst [vmem:[#allocation7 + $0x30] sm:$0xff] %v899_v12   ;;  %v445_v13 = vpop.f32.mrf.mxu2 }
 0x118   :  { %v534_v14 = vpop.f32.mrf.mxu3 }
 0x119   :  { %v535_v16 = vadd.f32 %v534_v14, %v445_v13  ;;  %v408_v17 = vpop.f32.mrf.mxu0 }
 0x11a   :  { %v497_v18 = vpop.f32.mrf.mxu1 }
 0x11b   :  { %v939_v19 = vpack.c.bf16 %v535_v16, %v533_v15  ;;  %v498_v24 = vadd.f32 %v497_v18, %v408_v17 }
 0x11d   :  { %959 = vst [vmem:[#allocation7 + $0x70] sm:$0xff] %v939_v19  }
 0x11f   :  { %v448_v20 = vpop.f32.mrf.mxu2 }
 0x120   :  { %v537_v21 = vpop.f32.mrf.mxu3 }
 0x121   :  { %v410_v22 = vpop.f32.mrf.mxu0  ;;  %v538_v29 = vadd.f32 %v537_v21, %v448_v20 }
 0x122   :  { %v499_v23 = vpop.f32.mrf.mxu1 }
 0x123   :  { %v500_v25 = vadd.f32 %v499_v23, %v410_v22 }
 0x125   :  { %v904_v26 = vpack.c.bf16 %v500_v25, %v498_v24 }
 0x127   :  { %952 = vst [vmem:[#allocation7 + $0x38] sm:$0xff] %v904_v26   ;;  %v450_v27 = vpop.f32.mrf.mxu2 }
 0x128   :  { %v539_v28 = vpop.f32.mrf.mxu3 }
 0x129   :  { %v540_v30 = vadd.f32 %v539_v28, %v450_v27 }
 0x12b   :  { %v944_v31 = vpack.c.bf16 %v540_v30, %v538_v29 }
 0x12d   :  { %960 = vst [vmem:[#allocation7 + $0x78] sm:$0xff] %v944_v31  }
 0x12e   :  { %618 = dma.vmem_to_hbm [thread:$0]  %s611_s1, 2048, %s613_s25, [#allocation4], %s1066_s21, %s1066_s21, %s1067_s22  }
 0x12f   :  { %1060 = dma.done.wait [#allocation4], 2048  }
 0x130   :  { %1061 = vsyncadd [#allocation4], 4294965248 }
 0x131   :  { %623 = vsyncpa [#allocation3], 1 }
 0x132   :  { %624 = vsyncpa [#allocation6], 1 }
 0x133   :  { %625 = vsyncpa [#allocation4], 1 }

</bundles_post_ra>
